<compile_context>
chip_gen: v5e
topology: v5e:2x2
jax: 0.10.0
libtpu: 0.0.40
codegen_flags: <defaults>
</compile_context>

<pallas_src>
import math

import jax
import jax.numpy as jnp
from jax.experimental import pallas as pl
from jax.experimental.pallas import tpu as pltpu


def _round_up(v, n):
    return ((v + n - 1) // n) * n


def _mlp_kernel(x_ref, w1_ref, b1_ref, w2_ref, b2_ref, o_ref):
    """One (TM, Cin) activation tile -> (TM, H) output tile.

    Weights arrive pre-transposed (contraction-major [K, N]) so both matmuls
    are plain x @ W on the MXU.  bf16 MXU inputs, f32 accumulation, bias add
    + ReLU in f32 (v5e has no bf16 VPU path).
    """
    x = x_ref[...].astype(jnp.bfloat16)                        # (TM, Cin)
    h = jnp.dot(x, w1_ref[...], preferred_element_type=jnp.float32)   # (TM, H)
    h = jnp.maximum(h + b1_ref[...], 0.0)                      # bias + ReLU, f32
    y = jnp.dot(h.astype(jnp.bfloat16), w2_ref[...],
                preferred_element_type=jnp.float32)            # (TM, H) f32
    y = y + b2_ref[...]
    o_ref[...] = y.astype(o_ref.dtype)


def _vmem_budget_bytes():
    """Per-generation VMEM budget: half of physical VMEM when discoverable
    (64 MiB on v5e/v6e, 32 MiB on v7x), else v5e's 16 MiB scoped default."""
    try:
        info = pltpu.get_tpu_info()
        for name in ("vmem_capacity_bytes", "vmem_bytes", "vmem_size_bytes"):
            cap = getattr(info, name, None)
            if cap:
                return max(int(cap) // 2, 16 * 1024 * 1024)
    except Exception:
        pass
    return 16 * 1024 * 1024


def _pick_tile_m(m, cin, h, x_bytes, out_bytes, budget, max_tile_m, w_bufs):
    """Largest M tile (multiple of 8) whose estimated footprint fits ~80% of
    `budget` (the same budget is enforced via vmem_limit_bytes)."""
    fixed = w_bufs * (cin * h * 2 + h * h * 2 + 2 * h * 4)     # resident weights/biases
    per_row = (2 * cin * x_bytes          # x tile, double-buffered
               + 2 * h * out_bytes        # out tile, double-buffered
               + 3 * h * 4)               # f32 hidden / epilogue temporaries
    avail = max(int(budget * 0.8) - fixed, 0)
    cap = max(avail // max(per_row, 1), 8)
    tm = min(max_tile_m, (cap // 8) * 8, _round_up(m, 8))
    return max(tm, 8)


def mlp_forward(x, w1, b1, w2, b2, *, max_tile_m=1024, out_dtype=None,
                single_buffer_weights=True):
    """Fused Linear -> ReLU -> Linear.

    x: (..., input_nc); w1: (output_nc, input_nc); b1: (output_nc,);
    w2: (output_nc, output_nc); b2: (output_nc,)  -- PyTorch nn.Linear layout.
    """
    h_dim, cin = w1.shape
    assert x.shape[-1] == cin
    assert w2.shape == (h_dim, h_dim)
    lead = x.shape[:-1]
    m = math.prod(lead) if lead else 1

    if out_dtype is None:
        out_dtype = x.dtype           # follow input/consumer dtype (bf16 halves writeback)

    budget = _vmem_budget_bytes()
    x_bytes = jnp.dtype(x.dtype).itemsize
    out_bytes = jnp.dtype(out_dtype).itemsize
    w_bufs = 1 if single_buffer_weights else 2
    tile_m = _pick_tile_m(m, cin, h_dim, x_bytes, out_bytes, budget,
                          max_tile_m, w_bufs)

    # Activations: streamed unpadded, native dtype (cast to bf16 in-kernel).
    # Ragged last M block: OOB rows produce garbage that is discarded on write.
    x2d = x.reshape(m, cin)

    # One-time wrapper-side weight prep (resident in VMEM, constant index_map):
    # transpose to contraction-major [K, N] and cast to bf16.
    w1t = jnp.asarray(w1, jnp.float32).T.astype(jnp.bfloat16)   # (cin, h)
    w2t = jnp.asarray(w2, jnp.float32).T.astype(jnp.bfloat16)   # (h, h)
    b1r = jnp.asarray(b1, jnp.float32).reshape(1, h_dim)
    b2r = jnp.asarray(b2, jnp.float32).reshape(1, h_dim)

    grid = (pl.cdiv(m, tile_m),)

    def _call(use_single_buffered_weights):
        def w_spec(shape):
            if use_single_buffered_weights:
                # Constant index_map -> single-buffer the resident weights,
                # halving their VMEM footprint (matters most on v7x's 64 MiB).
                return pl.BlockSpec(shape, lambda i: (0, 0),
                                    pipeline_mode=pl.Buffered(1))
            return pl.BlockSpec(shape, lambda i: (0, 0))

        return pl.pallas_call(
            _mlp_kernel,
            out_shape=jax.ShapeDtypeStruct((m, h_dim), out_dtype),
            grid_spec=pl.GridSpec(
                grid=grid,
                in_specs=[
                    # Activation tiles stream over the M grid axis.
                    pl.BlockSpec((tile_m, cin), lambda i: (i, 0)),
                    # Weights / biases: constant index_map -> loaded once.
                    w_spec((cin, h_dim)),
                    w_spec((1, h_dim)),
                    w_spec((h_dim, h_dim)),
                    w_spec((1, h_dim)),
                ],
                out_specs=pl.BlockSpec((tile_m, h_dim), lambda i: (i, 0)),
            ),
            compiler_params=pltpu.CompilerParams(
                # Independent M tiles -> shard across both TCs on v7x.
                # TODO(synk): confirm dual-TC occupancy in xprof; switch to
                # pltpu.CORE_PARALLEL if only one TC shows up.
                dimension_semantics=("parallel",),
                vmem_limit_bytes=int(budget)),
        )(x2d, w1t, b1r, w2t, b2r)

    if single_buffer_weights:
        try:
            out = _call(True)
        except Exception:
            # Older jax without BlockSpec(pipeline_mode=...) / Buffered(1).
            out = _call(False)
    else:
        out = _call(False)

    return out.reshape(*lead, h_dim)


def init_mlp_params(key, input_nc, output_nc):
    """Deterministic init mimicking nn.Linear's uniform(-1/sqrt(fan_in), ...)."""
    k1, k2, k3, k4 = jax.random.split(key, 4)
    lim1 = 1.0 / jnp.sqrt(jnp.float32(input_nc))
    lim2 = 1.0 / jnp.sqrt(jnp.float32(output_nc))
    w1 = jax.random.uniform(k1, (output_nc, input_nc), jnp.float32, -lim1, lim1)
    b1 = jax.random.uniform(k2, (output_nc,), jnp.float32, -lim1, lim1)
    w2 = jax.random.uniform(k3, (output_nc, output_nc), jnp.float32, -lim2, lim2)
    b2 = jax.random.uniform(k4, (output_nc,), jnp.float32, -lim2, lim2)
    return w1, b1, w2, b2


if __name__ == "__main__":
    input_nc, output_nc = 32, 32
    batch, seq = 2, 8

    key = jax.random.PRNGKey(0)
    kx, kp = jax.random.split(key)
    x = jax.random.normal(kx, (batch, seq, input_nc), jnp.float32)
    w1, b1, w2, b2 = init_mlp_params(kp, input_nc, output_nc)

    y = mlp_forward(x, w1, b1, w2, b2)
    y = jax.block_until_ready(y)

    # Pure-JAX reference (same math as the PyTorch module, f32).
    h_ref = jnp.maximum(x @ w1.T + b1, 0.0)
    y_ref = h_ref @ w2.T + b2
    assert y.shape == (batch, seq, output_nc)
    # bf16 MXU inputs with f32 accumulation -> relaxed tolerance vs f32 ref.
    assert jnp.allclose(y.astype(jnp.float32), y_ref, atol=3e-2, rtol=3e-2)

    print("KERNEL_OK")
</pallas_src>

<mosaic_0001>
module attributes {stable_mosaic.version = 11 : i64} {
  func.func @_mlp_kernel(%arg0: i32, %arg1: memref<16x32xf32, #tpu.memory_space<vmem>>, %arg2: memref<32x32xbf16, #tpu.memory_space<vmem>>, %arg3: memref<1x32xf32, #tpu.memory_space<vmem>>, %arg4: memref<32x32xbf16, #tpu.memory_space<vmem>>, %arg5: memref<1x32xf32, #tpu.memory_space<vmem>>, %arg6: memref<16x32xf32, #tpu.memory_space<vmem>>) attributes {dimension_semantics = [#tpu.dimension_semantics<parallel>], iteration_bounds = array<i64: 1>, scalar_prefetch = 0 : i64, scratch_operands = 0 : i64, tpu.core_type = #tpu.core_type<tc>, window_params = [{transform_indices = @transform_0, window_bounds = array<i64: 16, 32>}, {pipeline_mode = #tpu.pipeline_mode<synchronous>, transform_indices = @transform_1, window_bounds = array<i64: 32, 32>}, {pipeline_mode = #tpu.pipeline_mode<synchronous>, transform_indices = @transform_2, window_bounds = array<i64: 1, 32>}, {pipeline_mode = #tpu.pipeline_mode<synchronous>, transform_indices = @transform_3, window_bounds = array<i64: 32, 32>}, {pipeline_mode = #tpu.pipeline_mode<synchronous>, transform_indices = @transform_4, window_bounds = array<i64: 1, 32>}, {transform_indices = @transform_5, window_bounds = array<i64: 16, 32>}]} {
    %c0 = arith.constant 0 : index
    %c0_0 = arith.constant 0 : index
    %0 = vector.load %arg1[%c0, %c0_0] : memref<16x32xf32, #tpu.memory_space<vmem>>, vector<16x32xf32>
    %1 = arith.truncf %0 : vector<16x32xf32> to vector<16x32xbf16>
    %c0_1 = arith.constant 0 : index
    %c0_2 = arith.constant 0 : index
    %2 = vector.load %arg2[%c0_1, %c0_2] : memref<32x32xbf16, #tpu.memory_space<vmem>>, vector<32x32xbf16>
    %cst = arith.constant dense<0.000000e+00> : vector<16x32xf32>
    %3 = tpu.matmul %1, %2, %cst {dimension_numbers = #tpu.dot_dimension_numbers<[1], [0], [0], [1], [0, 0, 1, 1], [], []>} : vector<16x32xbf16>, vector<32x32xbf16>, vector<16x32xf32> -> vector<16x32xf32>
    %c0_3 = arith.constant 0 : index
    %c0_4 = arith.constant 0 : index
    %4 = vector.load %arg3[%c0_3, %c0_4] : memref<1x32xf32, #tpu.memory_space<vmem>>, vector<1x32xf32>
    %5 = vector.broadcast %4 : vector<1x32xf32> to vector<16x32xf32>
    %6 = arith.addf %3, %5 : vector<16x32xf32>
    %cst_5 = arith.constant 0.000000e+00 : f32
    %7 = vector.broadcast %cst_5 : f32 to vector<16x32xf32>
    %8 = arith.maximumf %6, %7 : vector<16x32xf32>
    %9 = arith.truncf %8 : vector<16x32xf32> to vector<16x32xbf16>
    %c0_6 = arith.constant 0 : index
    %c0_7 = arith.constant 0 : index
    %10 = vector.load %arg4[%c0_6, %c0_7] : memref<32x32xbf16, #tpu.memory_space<vmem>>, vector<32x32xbf16>
    %cst_8 = arith.constant dense<0.000000e+00> : vector<16x32xf32>
    %11 = tpu.matmul %9, %10, %cst_8 {dimension_numbers = #tpu.dot_dimension_numbers<[1], [0], [0], [1], [0, 0, 1, 1], [], []>} : vector<16x32xbf16>, vector<32x32xbf16>, vector<16x32xf32> -> vector<16x32xf32>
    %c0_9 = arith.constant 0 : index
    %c0_10 = arith.constant 0 : index
    %12 = vector.load %arg5[%c0_9, %c0_10] : memref<1x32xf32, #tpu.memory_space<vmem>>, vector<1x32xf32>
    %13 = vector.broadcast %12 : vector<1x32xf32> to vector<16x32xf32>
    %14 = arith.addf %11, %13 : vector<16x32xf32>
    %c0_11 = arith.constant 0 : index
    %c0_12 = arith.constant 0 : index
    %15 = vector.load %arg6[%c0_11, %c0_12] : memref<16x32xf32, #tpu.memory_space<vmem>>, vector<16x32xf32>
    tpu.vector_store %arg6[%c0_11, %c0_12], %14 {strides = array<i32>} : memref<16x32xf32, #tpu.memory_space<vmem>>, vector<16x32xf32>,
    return
  }
  func.func @transform_0(%arg0: i32) -> (i32, i32) {
    %c0_i32 = arith.constant 0 : i32
    %c0_i32_0 = arith.constant 0 : i32
    return %arg0, %c0_i32 : i32, i32
  }
  func.func @transform_1(%arg0: i32) -> (i32, i32) {
    %c0_i32 = arith.constant 0 : i32
    %c0_i32_0 = arith.constant 0 : i32
    %c0_i32_1 = arith.constant 0 : i32
    return %c0_i32, %c0_i32_0 : i32, i32
  }
  func.func @transform_2(%arg0: i32) -> (i32, i32) {
    %c0_i32 = arith.constant 0 : i32
    %c0_i32_0 = arith.constant 0 : i32
    %c0_i32_1 = arith.constant 0 : i32
    return %c0_i32, %c0_i32_0 : i32, i32
  }
  func.func @transform_3(%arg0: i32) -> (i32, i32) {
    %c0_i32 = arith.constant 0 : i32
    %c0_i32_0 = arith.constant 0 : i32
    %c0_i32_1 = arith.constant 0 : i32
    return %c0_i32, %c0_i32_0 : i32, i32
  }
  func.func @transform_4(%arg0: i32) -> (i32, i32) {
    %c0_i32 = arith.constant 0 : i32
    %c0_i32_0 = arith.constant 0 : i32
    %c0_i32_1 = arith.constant 0 : i32
    return %c0_i32, %c0_i32_0 : i32, i32
  }
  func.func @transform_5(%arg0: i32) -> (i32, i32) {
    %c0_i32 = arith.constant 0 : i32
    %c0_i32_0 = arith.constant 0 : i32
    return %arg0, %c0_i32 : i32, i32
  }
}

module attributes {stable_mosaic.version = 11 : i64} {
  func.func @_mlp_kernel(%arg0: i32, %arg1: memref<16x32xf32, #tpu.memory_space<vmem>>, %arg2: memref<32x32xbf16, #tpu.memory_space<vmem>>, %arg3: memref<1x32xf32, #tpu.memory_space<vmem>>, %arg4: memref<32x32xbf16, #tpu.memory_space<vmem>>, %arg5: memref<1x32xf32, #tpu.memory_space<vmem>>, %arg6: memref<16x32xf32, #tpu.memory_space<vmem>>) attributes {dimension_semantics = [#tpu.dimension_semantics<parallel>], iteration_bounds = array<i64: 1>, scalar_prefetch = 0 : i64, scratch_operands = 0 : i64, tpu.core_type = #tpu.core_type<tc>, window_params = [{transform_indices = @transform_0, window_bounds = array<i64: 16, 32>}, {pipeline_mode = #tpu.pipeline_mode<synchronous>, transform_indices = @transform_1, window_bounds = array<i64: 32, 32>}, {pipeline_mode = #tpu.pipeline_mode<synchronous>, transform_indices = @transform_2, window_bounds = array<i64: 1, 32>}, {pipeline_mode = #tpu.pipeline_mode<synchronous>, transform_indices = @transform_3, window_bounds = array<i64: 32, 32>}, {pipeline_mode = #tpu.pipeline_mode<synchronous>, transform_indices = @transform_4, window_bounds = array<i64: 1, 32>}, {transform_indices = @transform_5, window_bounds = array<i64: 16, 32>}]} {
    %c0 = arith.constant 0 : index
    %c0_0 = arith.constant 0 : index
    %0 = vector.load %arg1[%c0, %c0_0] : memref<16x32xf32, #tpu.memory_space<vmem>>, vector<16x32xf32>
    %1 = arith.truncf %0 : vector<16x32xf32> to vector<16x32xbf16>
    %c0_1 = arith.constant 0 : index
    %c0_2 = arith.constant 0 : index
    %2 = vector.load %arg2[%c0_1, %c0_2] : memref<32x32xbf16, #tpu.memory_space<vmem>>, vector<32x32xbf16>
    %cst = arith.constant dense<0.000000e+00> : vector<16x32xf32>
    %3 = tpu.matmul %1, %2, %cst {dimension_numbers = #tpu.dot_dimension_numbers<[1], [0], [0], [1], [0, 0, 1, 1], [], []>} : vector<16x32xbf16>, vector<32x32xbf16>, vector<16x32xf32> -> vector<16x32xf32>
    %c0_3 = arith.constant 0 : index
    %c0_4 = arith.constant 0 : index
    %4 = vector.load %arg3[%c0_3, %c0_4] : memref<1x32xf32, #tpu.memory_space<vmem>>, vector<1x32xf32>
    %5 = vector.broadcast %4 : vector<1x32xf32> to vector<16x32xf32>
    %6 = arith.addf %3, %5 : vector<16x32xf32>
    %cst_5 = arith.constant 0.000000e+00 : f32
    %7 = vector.broadcast %cst_5 : f32 to vector<16x32xf32>
    %8 = arith.maximumf %6, %7 : vector<16x32xf32>
    %9 = arith.truncf %8 : vector<16x32xf32> to vector<16x32xbf16>
    %c0_6 = arith.constant 0 : index
    %c0_7 = arith.constant 0 : index
    %10 = vector.load %arg4[%c0_6, %c0_7] : memref<32x32xbf16, #tpu.memory_space<vmem>>, vector<32x32xbf16>
    %cst_8 = arith.constant dense<0.000000e+00> : vector<16x32xf32>
    %11 = tpu.matmul %9, %10, %cst_8 {dimension_numbers = #tpu.dot_dimension_numbers<[1], [0], [0], [1], [0, 0, 1, 1], [], []>} : vector<16x32xbf16>, vector<32x32xbf16>, vector<16x32xf32> -> vector<16x32xf32>
    %c0_9 = arith.constant 0 : index
    %c0_10 = arith.constant 0 : index
    %12 = vector.load %arg5[%c0_9, %c0_10] : memref<1x32xf32, #tpu.memory_space<vmem>>, vector<1x32xf32>
    %13 = vector.broadcast %12 : vector<1x32xf32> to vector<16x32xf32>
    %14 = arith.addf %11, %13 : vector<16x32xf32>
    %c0_11 = arith.constant 0 : index
    %c0_12 = arith.constant 0 : index
    %15 = vector.load %arg6[%c0_11, %c0_12] : memref<16x32xf32, #tpu.memory_space<vmem>>, vector<16x32xf32>
    tpu.vector_store %arg6[%c0_11, %c0_12], %14 {strides = array<i32>} : memref<16x32xf32, #tpu.memory_space<vmem>>, vector<16x32xf32>,
    return
  }
  func.func @transform_0(%arg0: i32) -> (i32, i32) {
    %c0_i32 = arith.constant 0 : i32
    %c0_i32_0 = arith.constant 0 : i32
    return %arg0, %c0_i32 : i32, i32
  }
  func.func @transform_1(%arg0: i32) -> (i32, i32) {
    %c0_i32 = arith.constant 0 : i32
    %c0_i32_0 = arith.constant 0 : i32
    %c0_i32_1 = arith.constant 0 : i32
    return %c0_i32, %c0_i32_0 : i32, i32
  }
  func.func @transform_2(%arg0: i32) -> (i32, i32) {
    %c0_i32 = arith.constant 0 : i32
    %c0_i32_0 = arith.constant 0 : i32
    %c0_i32_1 = arith.constant 0 : i32
    return %c0_i32, %c0_i32_0 : i32, i32
  }
  func.func @transform_3(%arg0: i32) -> (i32, i32) {
    %c0_i32 = arith.constant 0 : i32
    %c0_i32_0 = arith.constant 0 : i32
    %c0_i32_1 = arith.constant 0 : i32
    return %c0_i32, %c0_i32_0 : i32, i32
  }
  func.func @transform_4(%arg0: i32) -> (i32, i32) {
    %c0_i32 = arith.constant 0 : i32
    %c0_i32_0 = arith.constant 0 : i32
    %c0_i32_1 = arith.constant 0 : i32
    return %c0_i32, %c0_i32_0 : i32, i32
  }
  func.func @transform_5(%arg0: i32) -> (i32, i32) {
    %c0_i32 = arith.constant 0 : i32
    %c0_i32_0 = arith.constant 0 : i32
    return %arg0, %c0_i32 : i32, i32
  }
}

</mosaic_0001>

<bundles_post_ra>
// kernel: tpu_custom_call.1
= control target key start
LH: loop header
LB: loop body
LE: loop exit
PB: predicated region body
PF: predicated region fallthrough
CT: control target
= control target key end

     0   :  { %10 = vsyncpa [#allocation3], 0  ;;  %s372_s0 = inlined_call_operand.hbm [shape: f32[16,32], index: 0, kind: input, shape index: {}]   ;;  %s373_s1 = inlined_call_operand.hbm [shape: bf16[32,32], index: 1, kind: input, shape index: {}]   ;;  %s374_s2 = inlined_call_operand.vmem [shape: f32[1,32], index: 2, kind: input, shape index: {}]   ;;  %s375_s3 = inlined_call_operand.hbm [shape: bf16[32,32], index: 3, kind: input, shape index: {}]   ;;  %s376_s4 = inlined_call_operand.vmem [shape: f32[1,32], index: 4, kind: input, shape index: {}]   ;;  %s377_s5 = inlined_call_operand.hbm [shape: f32[16,32], index: 5, kind: output, shape index: {}]  }
   0x1   :  { %11 = vsyncpa [#allocation6], 0  ;;  %s30_s20 = sshll.u32 %s373_s1, 4  ;;  %s31_s20 = int_to_ptr.hbm [resolvable:$true] %s30_s20 }
   0x2   :  { %12 = vsyncpa [#allocation4], 0  ;;  %s306_s21 = smov [#allocation5]   ;;  %s17_s25 = sshll.u32 %s372_s0, 4  ;;  %s18_s25 = int_to_ptr.hbm [resolvable:$true] %s17_s25 }
   0x3   :  { %s32_s22 = sshll.u32 %s306_s21, 4  ;;  %s307_s26 = smov 64   ;;  %s33_s22 = int_to_ptr.vmem [resolvable:$true] %s32_s22 }
   0x4   :  { %s308_s27 = smov 4   ;;  %s309_s28 = smov [#allocation2]  }
   0x5   :  { %38 = dma.hbm_to_vmem [thread:$0]  %s31_s20, 256, %s33_s22, [#allocation6], %s307_s26, %s307_s26, %s308_s27  }
   0x6   :  { %s19_s29 = sshll.u32 %s309_s28, 4  ;;  %s310_s30 = smov 128   ;;  %s20_s29 = int_to_ptr.vmem [resolvable:$true] %s19_s29 }
   0x7   :  { %s311_s6 = smov 8   ;;  %s45_s8 = sshll.u32 %s375_s3, 4  ;;  %s46_s8 = int_to_ptr.hbm [resolvable:$true] %s45_s8 }
   0x8   :  { %25 = dma.hbm_to_vmem [thread:$0]  %s18_s25, 256, %s20_s29, [#allocation3], %s310_s30, %s310_s30, %s311_s6  }
   0x9   :  { %s312_s9 = smov [#allocation7]  }
   0xa   :  { %s47_s0 = sshll.u32 %s312_s9, 4  ;;  %s48_s0 = int_to_ptr.vmem [resolvable:$true] %s47_s0 }
   0xb   :  { %53 = dma.hbm_to_vmem [thread:$0]  %s46_s8, 256, %s48_s0, [#allocation6], %s307_s26, %s307_s26, %s308_s27  }
   0xc   :  { %300 = dma.done.wait [#allocation3], 256  }
   0xd   :  { %301 = vsyncadd [#allocation3], 4294967040 }
   0xe   :  { %302 = dma.done.wait [#allocation6], 512  }
   0xf   :  { %303 = vsyncadd [#allocation6], 4294966784  ;;  %v191_v0 = vld [vmem:[#allocation5 + $0x8] sm:$0xff]  ;;  %v190_v1 = vld [vmem:[#allocation5] sm:$0xff]  ;;  %vm92_vm0 = vcmask 261120   ;;  %s313_s13 = smov [#allocation8]  }
  0x10   :  { %102 = vmatpush.bf16.msra.mxu0 %v191_v0  ;;  %v69_v2 = vld [vmem:[#allocation2] sm:$0xff]  ;;  %v70_v3 = vld [vmem:[#allocation2 + $0x8] sm:$0xff]  ;;  %s156_s14 = sshll.u32 %s313_s13, 4  ;;  %s158_s16 = sshll.u32 %s377_s5, 4  ;;  %s157_s14 = int_to_ptr.vmem [resolvable:$true] %s156_s14  ;;  %s159_s16 = int_to_ptr.hbm [resolvable:$true] %s158_s16 }
  0x11   :  { %v71_v4 = vpack.c.bf16 %v70_v3, %v69_v2  ;;  %v193_v5 = vld [vmem:[#allocation7 + $0x8] sm:$0xff]  ;;  %v192_v6 = vld [vmem:[#allocation7] sm:$0xff] }
  0x12   :  { %142 = vmatpush.bf16.msra.mxu1 %v193_v5  ;;  %v202_v8 = vld [vmem:[%s374_s2] ss:$0 sm:$0xff] }
  0x13   :  { %v203_v15 = vld [vmem:[%s376_s4] ss:$0 sm:$0xff] }
  0x14   :  { %103 = vmatpush.bf16.msra.mxu0 %v190_v1 }
  0x16   :  { %143 = vmatpush.bf16.msra.mxu1 %v192_v6 }
  0x17   :  { %180 = vmatmul.msk.bf16.vlgmr.msra.gmra.mxu0 %vm92_vm0, %v71_v4 }
  0x94   :  { %v105_v7 = vpop.f32.mrf.mxu0 }
  0x95   :  { %v106_v9 = vadd.f32 %v202_v8, %v105_v7 }
  0x97   :  { %v110_v12 = vmax.f32 %v106_v9, 0.0 }
  0x9c   :  { %v107_v10 = vpop.f32.mrf.mxu0 }
  0x9d   :  { %v108_v11 = vadd.f32 %v202_v8, %v107_v10 }
  0x9f   :  { %v111_v13 = vmax.f32 %v108_v11, 0.0 }
  0xa1   :  { %v112_v14 = vpack.c.bf16 %v111_v13, %v110_v12 }
  0xa3   :  { %189 = vmatmul.msk.bf16.vlgmr.msra.gmra.mxu1 %vm92_vm0, %v112_v14 }
 0x120   :  { %v145_v16 = vpop.f32.mrf.mxu1 }
 0x121   :  { %v146_v17 = vadd.f32 %v203_v15, %v145_v16 }
 0x123   :  { %150 = vst.msk [vmem:[#allocation8] sm:$0xff] %vm92_vm0, %v146_v17 }
 0x128   :  { %v147_v18 = vpop.f32.mrf.mxu1 }
 0x129   :  { %v148_v19 = vadd.f32 %v203_v15, %v147_v18 }
 0x12b   :  { %151 = vst.msk [vmem:[#allocation8 + $0x8] sm:$0xff] %vm92_vm0, %v148_v19 }
 0x12c   :  { %164 = dma.vmem_to_hbm [thread:$0]  %s157_s14, 256, %s159_s16, [#allocation4], %s310_s30, %s310_s30, %s311_s6  }
 0x12d   :  { %304 = dma.done.wait [#allocation4], 256  }
 0x12e   :  { %305 = vsyncadd [#allocation4], 4294967040 }
 0x12f   :  { %169 = vsyncpa [#allocation3], 1 }
 0x130   :  { %170 = vsyncpa [#allocation6], 1 }
 0x131   :  { %171 = vsyncpa [#allocation4], 1 }

// kernel: tpu_custom_call.1
= control target key start
LH: loop header
LB: loop body
LE: loop exit
PB: predicated region body
PF: predicated region fallthrough
CT: control target
= control target key end

     0   :  { %10 = vsyncpa [#allocation3], 0  ;;  %s372_s0 = inlined_call_operand.hbm [shape: f32[16,32], index: 0, kind: input, shape index: {}]   ;;  %s373_s1 = inlined_call_operand.hbm [shape: bf16[32,32], index: 1, kind: input, shape index: {}]   ;;  %s374_s2 = inlined_call_operand.vmem [shape: f32[1,32], index: 2, kind: input, shape index: {}]   ;;  %s375_s3 = inlined_call_operand.hbm [shape: bf16[32,32], index: 3, kind: input, shape index: {}]   ;;  %s376_s4 = inlined_call_operand.vmem [shape: f32[1,32], index: 4, kind: input, shape index: {}]   ;;  %s377_s5 = inlined_call_operand.hbm [shape: f32[16,32], index: 5, kind: output, shape index: {}]  }
   0x1   :  { %11 = vsyncpa [#allocation6], 0  ;;  %s30_s20 = sshll.u32 %s373_s1, 4  ;;  %s31_s20 = int_to_ptr.hbm [resolvable:$true] %s30_s20 }
   0x2   :  { %12 = vsyncpa [#allocation4], 0  ;;  %s306_s21 = smov [#allocation5]   ;;  %s17_s25 = sshll.u32 %s372_s0, 4  ;;  %s18_s25 = int_to_ptr.hbm [resolvable:$true] %s17_s25 }
   0x3   :  { %s32_s22 = sshll.u32 %s306_s21, 4  ;;  %s307_s26 = smov 64   ;;  %s33_s22 = int_to_ptr.vmem [resolvable:$true] %s32_s22 }
   0x4   :  { %s308_s27 = smov 4   ;;  %s309_s28 = smov [#allocation2]  }
   0x5   :  { %38 = dma.hbm_to_vmem [thread:$0]  %s31_s20, 256, %s33_s22, [#allocation6], %s307_s26, %s307_s26, %s308_s27  }
   0x6   :  { %s19_s29 = sshll.u32 %s309_s28, 4  ;;  %s310_s30 = smov 128   ;;  %s20_s29 = int_to_ptr.vmem [resolvable:$true] %s19_s29 }
   0x7   :  { %s311_s6 = smov 8   ;;  %s45_s8 = sshll.u32 %s375_s3, 4  ;;  %s46_s8 = int_to_ptr.hbm [resolvable:$true] %s45_s8 }
   0x8   :  { %25 = dma.hbm_to_vmem [thread:$0]  %s18_s25, 256, %s20_s29, [#allocation3], %s310_s30, %s310_s30, %s311_s6  }
   0x9   :  { %s312_s9 = smov [#allocation7]  }
   0xa   :  { %s47_s0 = sshll.u32 %s312_s9, 4  ;;  %s48_s0 = int_to_ptr.vmem [resolvable:$true] %s47_s0 }
   0xb   :  { %53 = dma.hbm_to_vmem [thread:$0]  %s46_s8, 256, %s48_s0, [#allocation6], %s307_s26, %s307_s26, %s308_s27  }
   0xc   :  { %300 = dma.done.wait [#allocation3], 256  }
   0xd   :  { %301 = vsyncadd [#allocation3], 4294967040 }
   0xe   :  { %302 = dma.done.wait [#allocation6], 512  }
   0xf   :  { %303 = vsyncadd [#allocation6], 4294966784  ;;  %v191_v0 = vld [vmem:[#allocation5 + $0x8] sm:$0xff]  ;;  %v190_v1 = vld [vmem:[#allocation5] sm:$0xff]  ;;  %vm92_vm0 = vcmask 261120   ;;  %s313_s13 = smov [#allocation8]  }
  0x10   :  { %102 = vmatpush.bf16.msra.mxu0 %v191_v0  ;;  %v69_v2 = vld [vmem:[#allocation2] sm:$0xff]  ;;  %v70_v3 = vld [vmem:[#allocation2 + $0x8] sm:$0xff]  ;;  %s156_s14 = sshll.u32 %s313_s13, 4  ;;  %s158_s16 = sshll.u32 %s377_s5, 4  ;;  %s157_s14 = int_to_ptr.vmem [resolvable:$true] %s156_s14  ;;  %s159_s16 = int_to_ptr.hbm [resolvable:$true] %s158_s16 }
  0x11   :  { %v71_v4 = vpack.c.bf16 %v70_v3, %v69_v2  ;;  %v193_v5 = vld [vmem:[#allocation7 + $0x8] sm:$0xff]  ;;  %v192_v6 = vld [vmem:[#allocation7] sm:$0xff] }
  0x12   :  { %142 = vmatpush.bf16.msra.mxu1 %v193_v5  ;;  %v202_v8 = vld [vmem:[%s374_s2] ss:$0 sm:$0xff] }
  0x13   :  { %v203_v15 = vld [vmem:[%s376_s4] ss:$0 sm:$0xff] }
  0x14   :  { %103 = vmatpush.bf16.msra.mxu0 %v190_v1 }
  0x16   :  { %143 = vmatpush.bf16.msra.mxu1 %v192_v6 }
  0x17   :  { %180 = vmatmul.msk.bf16.vlgmr.msra.gmra.mxu0 %vm92_vm0, %v71_v4 }
  0x94   :  { %v105_v7 = vpop.f32.mrf.mxu0 }
  0x95   :  { %v106_v9 = vadd.f32 %v202_v8, %v105_v7 }
  0x97   :  { %v110_v12 = vmax.f32 %v106_v9, 0.0 }
  0x9c   :  { %v107_v10 = vpop.f32.mrf.mxu0 }
  0x9d   :  { %v108_v11 = vadd.f32 %v202_v8, %v107_v10 }
  0x9f   :  { %v111_v13 = vmax.f32 %v108_v11, 0.0 }
  0xa1   :  { %v112_v14 = vpack.c.bf16 %v111_v13, %v110_v12 }
  0xa3   :  { %189 = vmatmul.msk.bf16.vlgmr.msra.gmra.mxu1 %vm92_vm0, %v112_v14 }
 0x120   :  { %v145_v16 = vpop.f32.mrf.mxu1 }
 0x121   :  { %v146_v17 = vadd.f32 %v203_v15, %v145_v16 }
 0x123   :  { %150 = vst.msk [vmem:[#allocation8] sm:$0xff] %vm92_vm0, %v146_v17 }
 0x128   :  { %v147_v18 = vpop.f32.mrf.mxu1 }
 0x129   :  { %v148_v19 = vadd.f32 %v203_v15, %v147_v18 }
 0x12b   :  { %151 = vst.msk [vmem:[#allocation8 + $0x8] sm:$0xff] %vm92_vm0, %v148_v19 }
 0x12c   :  { %164 = dma.vmem_to_hbm [thread:$0]  %s157_s14, 256, %s159_s16, [#allocation4], %s310_s30, %s310_s30, %s311_s6  }
 0x12d   :  { %304 = dma.done.wait [#allocation4], 256  }
 0x12e   :  { %305 = vsyncadd [#allocation4], 4294967040 }
 0x12f   :  { %169 = vsyncpa [#allocation3], 1 }
 0x130   :  { %170 = vsyncpa [#allocation6], 1 }
 0x131   :  { %171 = vsyncpa [#allocation4], 1 }

</bundles_post_ra>
